<compile_context>
chip_gen: v5e
topology: v5e:2x2
jax: 0.10.0
libtpu: 0.0.40
codegen_flags: <defaults>
</compile_context>

<pallas_src>
import functools

import jax
import jax.numpy as jnp
import numpy as np
from jax.experimental import pallas as pl
from jax.experimental.pallas import tpu as pltpu

_SUB = 128  # points per inner MXU sub-chunk


def _point_encoder_kernel(pts_ref, w1_ref, b1_ref, w2_ref, b2_ref,
                          out_ref, g_ref, *, sub):
    """One (batch-block, point-tile) pair per grid step.

    pts_ref : [bb, nt, C]  bf16 (xyz in 0:3, color in 3:6, zero-weight pad 6:C)
    w1_ref  : [C,  H]      bf16
    b1_ref  : [1,  H]      f32
    w2_ref  : [H,  E]      f32
    b2_ref  : [1,  E]      f32
    out_ref : [bb, E]      f32  (same block across the N axis -> resident)
    g_ref   : [bb, H]      f32  VMEM scratch: running max_n (x_n @ W1)
    """
    n_step = pl.program_id(1)
    bb, nt, c = pts_ref.shape
    hdim = w1_ref.shape[1]
    n_sub = nt // sub

    @pl.when(n_step == 0)
    def _init():
        g_ref[...] = jnp.full(g_ref.shape, -jnp.inf, dtype=g_ref.dtype)

    w1 = w1_ref[...]

    def body(i, running_max):
        start = pl.multiple_of(i * sub, sub)
        chunk = pts_ref[:, pl.ds(start, sub), :]            # [bb, sub, C] bf16
        # MXU: [bb*sub, C] @ [C, H] -> f32.  K=C is tiny, but the MXU is
        # otherwise idle and this frees every VPU slot for the max reduction.
        h = jnp.dot(chunk.reshape(bb * sub, c), w1,
                    preferred_element_type=jnp.float32)
        h = h.reshape(bb, sub, hdim)
        return jnp.maximum(running_max, jnp.max(h, axis=1))  # [bb, H]

    tile_max = jax.lax.fori_loop(
        0, n_sub, body,
        jnp.full((bb, hdim), -jnp.inf, dtype=jnp.float32),
        unroll=True)
    g_ref[...] = jnp.maximum(g_ref[...], tile_max)

    @pl.when(n_step == pl.num_programs(1) - 1)
    def _finish():
        # Bias + ReLU hoisted past the max-pool (both monotonic):
        #   max_n relu(x_n @ W1 + b1) == relu(max_n(x_n @ W1) + b1)
        g = jnp.maximum(g_ref[...] + b1_ref[...], 0.0)        # [bb, H]
        out = jnp.dot(g, w2_ref[...], preferred_element_type=jnp.float32)
        out_ref[...] = (out + b2_ref[...]).astype(out_ref.dtype)


def point_encoder_pallas(pc, w1, b1, w2, b2, *, n_tile=512, sub=_SUB):
    """pc: [B, N, 6] float32;  returns [B, E] float32."""
    B, N, C = pc.shape
    H = w1.shape[1]
    E = w2.shape[1]

    # Channel axis padded up to a multiple of 8; the appended W1 rows are zero,
    # so padded channels contribute exactly 0 to the contraction.
    C_pad = pl.cdiv(C, 8) * 8

    # Point-axis tiling: round N up to a multiple of `sub`; shrink the grid
    # tile if the whole (padded) cloud fits in a single tile.
    n_pad_sub = pl.cdiv(N, sub) * sub
    n_tile = max(sub, (min(n_tile, n_pad_sub) // sub) * sub)
    N_pad = pl.cdiv(N, n_tile) * n_tile

    # Batch blocking: tiny batches run as one full block (no wasted padded
    # rows); otherwise 8-row blocks so the "parallel" axis has >= 2 blocks
    # (shardable across v7x's two TensorCores).
    if B <= 8:
        bb, B_pad = B, B
    else:
        bb, B_pad = 8, pl.cdiv(B, 8) * 8

    # Edge-mode padding: padded points / batch rows replicate real rows, so the
    # max-pool needs no in-kernel tail masking.  Padded batch rows are sliced
    # off below; padded channels are killed by W1's zero rows.
    pc = jnp.pad(pc, ((0, B_pad - B), (0, N_pad - N), (0, C_pad - C)),
                 mode="edge")
    w1 = jnp.pad(w1, ((0, C_pad - C), (0, 0)))  # zero rows for padded channels

    pc_bf16 = pc.astype(jnp.bfloat16)           # halves HBM traffic
    w1_bf16 = w1.astype(jnp.bfloat16)

    grid = (B_pad // bb, N_pad // n_tile)
    kernel = functools.partial(_point_encoder_kernel, sub=sub)

    cost = pl.CostEstimate(
        flops=2 * B_pad * N_pad * C_pad * H + 2 * B_pad * H * E,
        transcendentals=0,
        bytes_accessed=(pc_bf16.size * 2 + w1_bf16.size * 2
                        + 4 * (b1.size + w2.size + b2.size + B_pad * E)),
    )

    out = pl.pallas_call(
        kernel,
        out_shape=jax.ShapeDtypeStruct((B_pad, E), jnp.float32),
        grid_spec=pltpu.PrefetchScalarGridSpec(
            num_scalar_prefetch=0,
            grid=grid,
            in_specs=[
                pl.BlockSpec((bb, n_tile, C_pad), lambda b, n: (b, n, 0)),
                pl.BlockSpec((C_pad, H), lambda b, n: (0, 0)),   # W1 resident
                pl.BlockSpec((1, H), lambda b, n: (0, 0)),       # b1 resident
                pl.BlockSpec((H, E), lambda b, n: (0, 0)),       # W2 resident
                pl.BlockSpec((1, E), lambda b, n: (0, 0)),       # b2 resident
            ],
            out_specs=pl.BlockSpec((bb, E), lambda b, n: (b, 0)),
            scratch_shapes=[pltpu.VMEM((bb, H), jnp.float32)],
        ),
        compiler_params=pltpu.CompilerParams(
            dimension_semantics=("parallel", "arbitrary")),
        cost_estimate=cost,
    )(pc_bf16, w1_bf16, b1, w2, b2)

    return out[:B]


class Uni3DPallas:
    """JAX/Pallas mirror of models/Uni3D.Uni3D with a synthetic point encoder."""

    def __init__(self, hidden=128, embed_dim=128):
        self.hidden = hidden
        self.embed_dim = embed_dim

        # logit_scale = log(1 / 0.07), exactly as in the PyTorch __init__.
        self.logit_scale = jnp.asarray(np.log(1.0 / 0.07), dtype=jnp.float32)

        # Deterministic synthetic point-encoder parameters.
        k = jax.random.PRNGKey(42)
        k1, k2, k3, k4 = jax.random.split(k, 4)
        self.w1 = (jax.random.normal(k1, (6, hidden), jnp.float32)
                   * (1.0 / np.sqrt(6.0)))
        self.b1 = jax.random.normal(k4, (1, hidden), jnp.float32) * 0.1
        self.w2 = (jax.random.normal(k2, (hidden, embed_dim), jnp.float32)
                   * (1.0 / np.sqrt(hidden)))
        self.b2 = jax.random.normal(k3, (1, embed_dim), jnp.float32) * 0.01

    def encode_pc(self, pc):
        # The reference's xyz = pc[:, :, :3] / color = pc[:, :, 3:] split is
        # fused into the kernel (W1 rows 0:3 multiply xyz, rows 3:6 color), so
        # the point cloud is streamed once without strided copies.
        return point_encoder_pallas(pc, self.w1, self.b1, self.w2, self.b2)

    def forward(self, pc, text=None, image=None):
        # TODO(synk): reference forward raises NotImplementedError; only
        # encode_pc has concrete semantics, so that is what we implement.
        raise NotImplementedError


def _reference_encode_pc(model, pc):
    """Host (float64) reference; MLP inputs truncated to bf16 to match the
    kernel's bf16 MXU streaming path, everything else in full precision."""
    pc64 = np.asarray(jnp.asarray(pc, jnp.bfloat16).astype(jnp.float32),
                      np.float64)
    w1 = np.asarray(jnp.asarray(model.w1, jnp.bfloat16).astype(jnp.float32),
                    np.float64)
    b1 = np.asarray(model.b1, np.float64)[0]
    w2 = np.asarray(model.w2, np.float64)
    b2 = np.asarray(model.b2, np.float64)[0]
    h = np.maximum(pc64 @ w1 + b1, 0.0)     # [B, N, H]
    g = h.max(axis=1)                       # [B, H]
    return g @ w2 + b2                      # [B, E]


if __name__ == "__main__":
    # N not a multiple of the 128-point sub-chunk -> exercises edge padding.
    B, N = 4, 333
    model = Uni3DPallas(hidden=128, embed_dim=128)

    key = jax.random.PRNGKey(0)
    pc = jax.random.normal(key, (B, N, 6), jnp.float32)   # xyz (3) + rgb (3)

    # Default tiling (single point-tile for this small N).
    feat = jax.block_until_ready(model.encode_pc(pc))
    # Smaller point tile -> two grid steps over N, exercising the cross-step
    # running-max accumulator.
    feat_multi = jax.block_until_ready(
        point_encoder_pallas(pc, model.w1, model.b1, model.w2, model.b2,
                             n_tile=256))

    ref = _reference_encode_pc(model, pc)
    # bf16-level tolerance: the per-point MLP streams bf16 operands (f32
    # accumulation) and the head matmul uses default MXU precision.
    np.testing.assert_allclose(np.asarray(feat, np.float64), ref,
                               rtol=2e-2, atol=5e-2)
    np.testing.assert_allclose(np.asarray(feat_multi, np.float64), ref,
                               rtol=2e-2, atol=5e-2)

    # logit_scale is a module parameter consumed by the external CLIP loss.
    _ = jnp.exp(model.logit_scale)

    print("KERNEL_OK")
</pallas_src>

<mosaic_0001>
module attributes {stable_mosaic.version = 11 : i64} {
  func.func @_point_encoder_kernel(%arg0: i32, %arg1: i32, %arg2: memref<4x384x8xbf16, #tpu.memory_space<vmem>>, %arg3: memref<8x128xbf16, #tpu.memory_space<vmem>>, %arg4: memref<1x128xf32, #tpu.memory_space<vmem>>, %arg5: memref<128x128xf32, #tpu.memory_space<vmem>>, %arg6: memref<1x128xf32, #tpu.memory_space<vmem>>, %arg7: memref<4x128xf32, #tpu.memory_space<vmem>>, %arg8: memref<4x128xf32, #tpu.memory_space<vmem>>) attributes {dimension_semantics = [#tpu.dimension_semantics<parallel>, #tpu.dimension_semantics<arbitrary>], iteration_bounds = array<i64: 1, 1>, scalar_prefetch = 0 : i64, scratch_operands = 1 : i64, tpu.core_type = #tpu.core_type<tc>, window_params = [{transform_indices = @transform_0, window_bounds = array<i64: 4, 384, 8>}, {pipeline_mode = #tpu.pipeline_mode<synchronous>, transform_indices = @transform_1, window_bounds = array<i64: 8, 128>}, {pipeline_mode = #tpu.pipeline_mode<synchronous>, transform_indices = @transform_2, window_bounds = array<i64: 1, 128>}, {pipeline_mode = #tpu.pipeline_mode<synchronous>, transform_indices = @transform_3, window_bounds = array<i64: 128, 128>}, {pipeline_mode = #tpu.pipeline_mode<synchronous>, transform_indices = @transform_4, window_bounds = array<i64: 1, 128>}, {transform_indices = @transform_5, window_bounds = array<i64: 4, 128>}]} {
    %c0_i32 = arith.constant 0 : i32
    %0 = arith.cmpi eq, %arg1, %c0_i32 : i32
    %1 = arith.extui %0 : i1 to i32
    %c0_i32_0 = arith.constant 0 : i32
    %2 = arith.cmpi ne, %1, %c0_i32_0 : i32
    scf.if %2 {
      %cst_23 = arith.constant 0xFF800000 : f32
      %38 = vector.broadcast %cst_23 : f32 to vector<4x128xf32>
      %c0_24 = arith.constant 0 : index
      %c0_25 = arith.constant 0 : index
      %39 = vector.load %arg8[%c0_24, %c0_25] : memref<4x128xf32, #tpu.memory_space<vmem>>, vector<4x128xf32>
      tpu.vector_store %arg8[%c0_24, %c0_25], %38 {strides = array<i32>} : memref<4x128xf32, #tpu.memory_space<vmem>>, vector<4x128xf32>,
    } else {
    }
    %c0 = arith.constant 0 : index
    %c0_1 = arith.constant 0 : index
    %3 = vector.load %arg3[%c0, %c0_1] : memref<8x128xbf16, #tpu.memory_space<vmem>>, vector<8x128xbf16>
    %cst = arith.constant 0xFF800000 : f32
    %4 = vector.broadcast %cst : f32 to vector<4x128xf32>
    %c0_i32_2 = arith.constant 0 : i32
    %c128_i32 = arith.constant 128 : i32
    %5 = arith.muli %c0_i32_2, %c128_i32 : i32
    %6 = tpu.assume_multiple %5, 128 : i32
    %c0_3 = arith.constant 0 : index
    %7 = arith.index_cast %6 : i32 to index
    %c0_4 = arith.constant 0 : index
    %8 = vector.load %arg2[%c0_3, %7, %c0_4] : memref<4x384x8xbf16, #tpu.memory_space<vmem>>, vector<4x128x8xbf16>
    %9 = vector.shape_cast %8 : vector<4x128x8xbf16> to vector<512x8xbf16>
    %cst_5 = arith.constant dense<0.000000e+00> : vector<512x128xf32>
    %10 = tpu.matmul %9, %3, %cst_5 {dimension_numbers = #tpu.dot_dimension_numbers<[1], [0], [0], [1], [0, 0, 1, 1], [], []>} : vector<512x8xbf16>, vector<8x128xbf16>, vector<512x128xf32> -> vector<512x128xf32>
    %11 = vector.shape_cast %10 : vector<512x128xf32> to vector<4x128x128xf32>
    %cst_6 = arith.constant dense<0xFF800000> : vector<4x128xf32>
    %12 = vector.multi_reduction <maximumf>, %11, %cst_6 [1] : vector<4x128x128xf32> to vector<4x128xf32>
    %13 = arith.maximumf %4, %12 : vector<4x128xf32>
    %c1_i32 = arith.constant 1 : i32
    %c128_i32_7 = arith.constant 128 : i32
    %14 = arith.muli %c1_i32, %c128_i32_7 : i32
    %15 = tpu.assume_multiple %14, 128 : i32
    %c0_8 = arith.constant 0 : index
    %16 = arith.index_cast %15 : i32 to index
    %c0_9 = arith.constant 0 : index
    %17 = vector.load %arg2[%c0_8, %16, %c0_9] : memref<4x384x8xbf16, #tpu.memory_space<vmem>>, vector<4x128x8xbf16>
    %18 = vector.shape_cast %17 : vector<4x128x8xbf16> to vector<512x8xbf16>
    %cst_10 = arith.constant dense<0.000000e+00> : vector<512x128xf32>
    %19 = tpu.matmul %18, %3, %cst_10 {dimension_numbers = #tpu.dot_dimension_numbers<[1], [0], [0], [1], [0, 0, 1, 1], [], []>} : vector<512x8xbf16>, vector<8x128xbf16>, vector<512x128xf32> -> vector<512x128xf32>
    %20 = vector.shape_cast %19 : vector<512x128xf32> to vector<4x128x128xf32>
    %cst_11 = arith.constant dense<0xFF800000> : vector<4x128xf32>
    %21 = vector.multi_reduction <maximumf>, %20, %cst_11 [1] : vector<4x128x128xf32> to vector<4x128xf32>
    %22 = arith.maximumf %13, %21 : vector<4x128xf32>
    %c2_i32 = arith.constant 2 : i32
    %c128_i32_12 = arith.constant 128 : i32
    %23 = arith.muli %c2_i32, %c128_i32_12 : i32
    %24 = tpu.assume_multiple %23, 128 : i32
    %c0_13 = arith.constant 0 : index
    %25 = arith.index_cast %24 : i32 to index
    %c0_14 = arith.constant 0 : index
    %26 = vector.load %arg2[%c0_13, %25, %c0_14] : memref<4x384x8xbf16, #tpu.memory_space<vmem>>, vector<4x128x8xbf16>
    %27 = vector.shape_cast %26 : vector<4x128x8xbf16> to vector<512x8xbf16>
    %cst_15 = arith.constant dense<0.000000e+00> : vector<512x128xf32>
    %28 = tpu.matmul %27, %3, %cst_15 {dimension_numbers = #tpu.dot_dimension_numbers<[1], [0], [0], [1], [0, 0, 1, 1], [], []>} : vector<512x8xbf16>, vector<8x128xbf16>, vector<512x128xf32> -> vector<512x128xf32>
    %29 = vector.shape_cast %28 : vector<512x128xf32> to vector<4x128x128xf32>
    %cst_16 = arith.constant dense<0xFF800000> : vector<4x128xf32>
    %30 = vector.multi_reduction <maximumf>, %29, %cst_16 [1] : vector<4x128x128xf32> to vector<4x128xf32>
    %31 = arith.maximumf %22, %30 : vector<4x128xf32>
    %c3_i32 = arith.constant 3 : i32
    %c0_17 = arith.constant 0 : index
    %c0_18 = arith.constant 0 : index
    %32 = vector.load %arg8[%c0_17, %c0_18] : memref<4x128xf32, #tpu.memory_space<vmem>>, vector<4x128xf32>
    %33 = arith.maximumf %32, %31 : vector<4x128xf32>
    %c0_19 = arith.constant 0 : index
    %c0_20 = arith.constant 0 : index
    %34 = vector.load %arg8[%c0_19, %c0_20] : memref<4x128xf32, #tpu.memory_space<vmem>>, vector<4x128xf32>
    tpu.vector_store %arg8[%c0_19, %c0_20], %33 {strides = array<i32>} : memref<4x128xf32, #tpu.memory_space<vmem>>, vector<4x128xf32>,
    %c0_i32_21 = arith.constant 0 : i32
    %35 = arith.cmpi eq, %arg1, %c0_i32_21 : i32
    %36 = arith.extui %35 : i1 to i32
    %c0_i32_22 = arith.constant 0 : i32
    %37 = arith.cmpi ne, %36, %c0_i32_22 : i32
    scf.if %37 {
      %c0_23 = arith.constant 0 : index
      %c0_24 = arith.constant 0 : index
      %38 = vector.load %arg8[%c0_23, %c0_24] : memref<4x128xf32, #tpu.memory_space<vmem>>, vector<4x128xf32>
      %c0_25 = arith.constant 0 : index
      %c0_26 = arith.constant 0 : index
      %39 = vector.load %arg4[%c0_25, %c0_26] : memref<1x128xf32, #tpu.memory_space<vmem>>, vector<1x128xf32>
      %40 = vector.broadcast %39 : vector<1x128xf32> to vector<4x128xf32>
      %41 = arith.addf %38, %40 : vector<4x128xf32>
      %cst_27 = arith.constant 0.000000e+00 : f32
      %42 = vector.broadcast %cst_27 : f32 to vector<4x128xf32>
      %43 = arith.maximumf %41, %42 : vector<4x128xf32>
      %c0_28 = arith.constant 0 : index
      %c0_29 = arith.constant 0 : index
      %44 = vector.load %arg5[%c0_28, %c0_29] : memref<128x128xf32, #tpu.memory_space<vmem>>, vector<128x128xf32>
      %cst_30 = arith.constant dense<0.000000e+00> : vector<4x128xf32>
      %45 = tpu.matmul %43, %44, %cst_30 {dimension_numbers = #tpu.dot_dimension_numbers<[1], [0], [0], [1], [0, 0, 1, 1], [], []>} : vector<4x128xf32>, vector<128x128xf32>, vector<4x128xf32> -> vector<4x128xf32>
      %c0_31 = arith.constant 0 : index
      %c0_32 = arith.constant 0 : index
      %46 = vector.load %arg6[%c0_31, %c0_32] : memref<1x128xf32, #tpu.memory_space<vmem>>, vector<1x128xf32>
      %47 = vector.broadcast %46 : vector<1x128xf32> to vector<4x128xf32>
      %48 = arith.addf %45, %47 : vector<4x128xf32>
      %c0_33 = arith.constant 0 : index
      %c0_34 = arith.constant 0 : index
      %49 = vector.load %arg7[%c0_33, %c0_34] : memref<4x128xf32, #tpu.memory_space<vmem>>, vector<4x128xf32>
      tpu.vector_store %arg7[%c0_33, %c0_34], %48 {strides = array<i32>} : memref<4x128xf32, #tpu.memory_space<vmem>>, vector<4x128xf32>,
    } else {
    }
    return
  }
  func.func @transform_0(%arg0: i32, %arg1: i32) -> (i32, i32, i32) {
    %c0_i32 = arith.constant 0 : i32
    %c0_i32_0 = arith.constant 0 : i32
    return %arg0, %arg1, %c0_i32 : i32, i32, i32
  }
  func.func @transform_1(%arg0: i32, %arg1: i32) -> (i32, i32) {
    %c0_i32 = arith.constant 0 : i32
    %c0_i32_0 = arith.constant 0 : i32
    %c0_i32_1 = arith.constant 0 : i32
    return %c0_i32, %c0_i32_0 : i32, i32
  }
  func.func @transform_2(%arg0: i32, %arg1: i32) -> (i32, i32) {
    %c0_i32 = arith.constant 0 : i32
    %c0_i32_0 = arith.constant 0 : i32
    %c0_i32_1 = arith.constant 0 : i32
    return %c0_i32, %c0_i32_0 : i32, i32
  }
  func.func @transform_3(%arg0: i32, %arg1: i32) -> (i32, i32) {
    %c0_i32 = arith.constant 0 : i32
    %c0_i32_0 = arith.constant 0 : i32
    %c0_i32_1 = arith.constant 0 : i32
    return %c0_i32, %c0_i32_0 : i32, i32
  }
  func.func @transform_4(%arg0: i32, %arg1: i32) -> (i32, i32) {
    %c0_i32 = arith.constant 0 : i32
    %c0_i32_0 = arith.constant 0 : i32
    %c0_i32_1 = arith.constant 0 : i32
    return %c0_i32, %c0_i32_0 : i32, i32
  }
  func.func @transform_5(%arg0: i32, %arg1: i32) -> (i32, i32) {
    %c0_i32 = arith.constant 0 : i32
    %c0_i32_0 = arith.constant 0 : i32
    return %arg0, %c0_i32 : i32, i32
  }
}

</mosaic_0001>

<bundles_post_ra>
// kernel: tpu_custom_call.1
= control target key start
LH: loop header
LB: loop body
LE: loop exit
PB: predicated region body
PF: predicated region fallthrough
CT: control target
= control target key end

     0   :  { %vm349_vm0 = vcmask 1043456   ;;  %vm252_vm1 = vcmask 64512   ;;  %s3110_s0 = inlined_call_operand.vmem [shape: bf16[4,384,8], index: 0, kind: input, shape index: {}]   ;;  %s3111_s1 = inlined_call_operand.vmem [shape: bf16[8,128], index: 1, kind: input, shape index: {}]   ;;  %s3112_s2 = inlined_call_operand.vmem [shape: f32[1,128], index: 2, kind: input, shape index: {}]   ;;  %s3113_s3 = inlined_call_operand.vmem [shape: f32[128,128], index: 3, kind: input, shape index: {}]   ;;  %s3114_s4 = inlined_call_operand.vmem [shape: f32[1,128], index: 4, kind: input, shape index: {}]   ;;  %s3115_s5 = inlined_call_operand.hbm [shape: f32[4,128], index: 5, kind: output, shape index: {}]  }
   0x1   :  { %v27_v0 = vld [vmem:[%s3111_s1] sm:$0xf]  ;;  %v2476_v5 = vld [vmem:[%s3110_s0 + $0x248] sm:$0xff] }
   0x2   :  { %v351_v1 = vsel %vm349_vm0, %v27_v0, 0  ;;  %v2451_v2 = vld [vmem:[%s3110_s0] sm:$0xff] }
   0x3   :  { %v2483_v3 = vld [vmem:[%s3110_s0 + $0x40] sm:$0xff]  ;;  %360 = vmatpush.bf16.msra.mxu0 %v351_v1  ;;  %934 = vmatpush.bf16.msra.mxu1 %v351_v1 }
   0x4   :  { %v2515_v4 = vld [vmem:[%s3110_s0 + $0x80] sm:$0xff]  ;;  %1512 = vmatpush.bf16.msra.mxu2 %v351_v1  ;;  %2547 = vmatpush.bf16.msra.mxu3 %v351_v1 }
   0x6   :  { %1971 = vmatmul.msk.bf16.vlgmr.msra.gmra.mxu0 %vm252_vm1, %v2451_v2  ;;  %2195 = vmatmul.msk.bf16.vlgmr.msra.gmra.mxu1 %vm252_vm1, %v2483_v3 }
   0x8   :  { %2548 = vmatpush.bf16.msrb.mxu3 %v351_v1 }
   0x9   :  { %10 = vsyncpa [#allocation4], 0  ;;  %2419 = vmatmul.msk.bf16.vlgmr.msra.gmra.mxu2 %vm252_vm1, %v2515_v4  ;;  %1996 = vmatmul.msk.bf16.vlgmr.msra.gmra.mxu3 %vm252_vm1, %v2476_v5  ;;  %v2452_v6 = vld [vmem:[%s3110_s0 + $0x8] sm:$0xff]  ;;  %v2477_v9 = vld [vmem:[%s3110_s0 + $0x250] sm:$0xff]  ;;  %vm1767_vm2 = vcmask 1041409   ;;  %vm1769_vm3 = vcmask 1042434  }
   0xa   :  { %v2484_v7 = vld [vmem:[%s3110_s0 + $0x48] sm:$0xff]  ;;  %v2453_v10 = vld [vmem:[%s3110_s0 + $0x10] sm:$0xff]  ;;  %v2478_v13 = vld [vmem:[%s3110_s0 + $0x258] sm:$0xff]  ;;  %vm1771_vm4 = vcmask 1043459   ;;  %s2581_s11 = smov [#allocation3]   ;;  %s1834_s15 = sshll.u32 %s3115_s5, 4  ;;  %s1835_s15 = int_to_ptr.hbm [resolvable:$true] %s1834_s15 }
   0xb   :  { %v2516_v8 = vld [vmem:[%s3110_s0 + $0x88] sm:$0xff]  ;;  %v2485_v11 = vld [vmem:[%s3110_s0 + $0x50] sm:$0xff]  ;;  %v2454_v14 = vld [vmem:[%s3110_s0 + $0x18] sm:$0xff]  ;;  %s1832_s12 = sshll.u32 %s2581_s11, 4  ;;  %s1833_s12 = int_to_ptr.vmem [resolvable:$true] %s1832_s12 }
   0xc   :  { %2549 = vmatpush.bf16.msra.mxu3 %v351_v1  ;;  %v2517_v12 = vld [vmem:[%s3110_s0 + $0x90] sm:$0xff]  ;;  %v2486_v15 = vld [vmem:[%s3110_s0 + $0x58] sm:$0xff]  ;;  %v2479_v17 = vld [vmem:[%s3110_s0 + $0x260] sm:$0xff] }
   0xd   :  { %v2518_v16 = vld [vmem:[%s3110_s0 + $0x98] sm:$0xff]  ;;  %v2455_v18 = vld [vmem:[%s3110_s0 + $0x20] sm:$0xff]  ;;  %v2480_v21 = vld [vmem:[%s3110_s0 + $0x268] sm:$0xff] }
   0xe   :  { %v2487_v19 = vld [vmem:[%s3110_s0 + $0x60] sm:$0xff]  ;;  %v2456_v22 = vld [vmem:[%s3110_s0 + $0x28] sm:$0xff]  ;;  %v2481_v25 = vld [vmem:[%s3110_s0 + $0x270] sm:$0xff] }
   0xf   :  { %v2519_v20 = vld [vmem:[%s3110_s0 + $0xa0] sm:$0xff]  ;;  %v2488_v23 = vld [vmem:[%s3110_s0 + $0x68] sm:$0xff]  ;;  %v2457_v26 = vld [vmem:[%s3110_s0 + $0x30] sm:$0xff] }
  0x10   :  { %v2520_v24 = vld [vmem:[%s3110_s0 + $0xa8] sm:$0xff]  ;;  %v2489_v27 = vld [vmem:[%s3110_s0 + $0x70] sm:$0xff]  ;;  %v2482_v29 = vld [vmem:[%s3110_s0 + $0x278] sm:$0xff] }
  0x11   :  { %v2521_v28 = vld [vmem:[%s3110_s0 + $0xb0] sm:$0xff]  ;;  %v2458_v30 = vld [vmem:[%s3110_s0 + $0x38] sm:$0xff]  ;;  %v2508_v33 = vld [vmem:[%s3110_s0 + $0x288] sm:$0xff] }
  0x12   :  { %v2490_v31 = vld [vmem:[%s3110_s0 + $0x78] sm:$0xff]  ;;  %v2459_v34 = vld [vmem:[%s3110_s0 + $0xc0] sm:$0xff]  ;;  %v2509_v39 = vld [vmem:[%s3110_s0 + $0x290] sm:$0xff] }
  0x13   :  { %v2522_v32 = vld [vmem:[%s3110_s0 + $0xb8] sm:$0xff]  ;;  %v2491_v35 = vld [vmem:[%s3110_s0 + $0x100] sm:$0xff]  ;;  %v2460_v47 = vld [vmem:[%s3110_s0 + $0xc8] sm:$0xff] }
  0x14   :  { %v2523_v38 = vld [vmem:[%s3110_s0 + $0x140] sm:$0xff]  ;;  %v2492_v48 = vld [vmem:[%s3110_s0 + $0x108] sm:$0xff]  ;;  %v2510_v54 = vld [vmem:[%s3110_s0 + $0x298] sm:$0xff] }
  0x15   :  { %v2524_v53 = vld [vmem:[%s3110_s0 + $0x148] sm:$0xff]  ;;  %v2461_v1 = vld [vmem:[%s3110_s0 + $0xd0] sm:$0xff] }
  0x16   :  { %1972 = vmatmul.msk.bf16.gmra.mxu0 %vm252_vm1, %v2452_v6  ;;  %2196 = vmatmul.msk.bf16.gmra.mxu1 %vm252_vm1, %v2484_v7  ;;  %v2493_v2 = vld [vmem:[%s3110_s0 + $0x110] sm:$0xff] }
  0x17   :  { %v2525_v7 = vld [vmem:[%s3110_s0 + $0x150] sm:$0xff] }
  0x19   :  { %2420 = vmatmul.msk.bf16.gmra.mxu2 %vm252_vm1, %v2516_v8  ;;  %1997 = vmatmul.msk.bf16.gmra.mxu3 %vm252_vm1, %v2477_v9  ;;  %v2511_v8 = vld [vmem:[%s3110_s0 + $0x2a0] sm:$0xff] }
  0x26   :  { %1973 = vmatmul.msk.bf16.gmra.mxu0 %vm252_vm1, %v2453_v10  ;;  %2197 = vmatmul.msk.bf16.gmra.mxu1 %vm252_vm1, %v2485_v11 }
  0x29   :  { %2421 = vmatmul.msk.bf16.gmra.mxu2 %vm252_vm1, %v2517_v12  ;;  %1998 = vmatmul.msk.bf16.gmra.mxu3 %vm252_vm1, %v2478_v13 }
  0x36   :  { %1974 = vmatmul.msk.bf16.gmra.mxu0 %vm252_vm1, %v2454_v14  ;;  %2198 = vmatmul.msk.bf16.gmra.mxu1 %vm252_vm1, %v2486_v15 }
  0x39   :  { %2422 = vmatmul.msk.bf16.gmra.mxu2 %vm252_vm1, %v2518_v16  ;;  %1999 = vmatmul.msk.bf16.gmra.mxu3 %vm252_vm1, %v2479_v17 }
  0x46   :  { %1975 = vmatmul.msk.bf16.gmra.mxu0 %vm252_vm1, %v2455_v18  ;;  %2199 = vmatmul.msk.bf16.gmra.mxu1 %vm252_vm1, %v2487_v19  ;;  %v2462_v19 = vld [vmem:[%s3110_s0 + $0xd8] sm:$0xff] }
  0x49   :  { %2423 = vmatmul.msk.bf16.gmra.mxu2 %vm252_vm1, %v2519_v20  ;;  %2000 = vmatmul.msk.bf16.gmra.mxu3 %vm252_vm1, %v2480_v21  ;;  %v2494_v20 = vld [vmem:[%s3110_s0 + $0x118] sm:$0xff] }
  0x56   :  { %1976 = vmatmul.msk.bf16.gmra.mxu0 %vm252_vm1, %v2456_v22  ;;  %2200 = vmatmul.msk.bf16.gmra.mxu1 %vm252_vm1, %v2488_v23 }
  0x59   :  { %2424 = vmatmul.msk.bf16.gmra.mxu2 %vm252_vm1, %v2520_v24  ;;  %2001 = vmatmul.msk.bf16.gmra.mxu3 %vm252_vm1, %v2481_v25  ;;  %v2526_v25 = vld [vmem:[%s3110_s0 + $0x158] sm:$0xff] }
  0x66   :  { %1977 = vmatmul.msk.bf16.gmra.mxu0 %vm252_vm1, %v2457_v26  ;;  %2201 = vmatmul.msk.bf16.gmra.mxu1 %vm252_vm1, %v2489_v27  ;;  %v2512_v27 = vld [vmem:[%s3110_s0 + $0x2a8] sm:$0xff] }
  0x69   :  { %2425 = vmatmul.msk.bf16.gmra.mxu2 %vm252_vm1, %v2521_v28  ;;  %2002 = vmatmul.msk.bf16.gmra.mxu3 %vm252_vm1, %v2482_v29 }
  0x76   :  { %1978 = vmatmul.msk.bf16.gmra.mxu0 %vm252_vm1, %v2458_v30  ;;  %2202 = vmatmul.msk.bf16.gmra.mxu1 %vm252_vm1, %v2490_v31 }
  0x79   :  { %2426 = vmatmul.msk.bf16.gmra.mxu2 %vm252_vm1, %v2522_v32  ;;  %2220 = vmatmul.msk.bf16.vlgmr.msrb.gmra.mxu3 %vm252_vm1, %v2508_v33 }
  0x83   :  { %v362_v36 = vpop.f32.mrf.mxu0  ;;  %v936_v37 = vpop.f32.mrf.mxu1 }
  0x86   :  { %1979 = vmatmul.msk.bf16.gmra.mxu0 %vm252_vm1, %v2459_v34  ;;  %2203 = vmatmul.msk.bf16.gmra.mxu1 %vm252_vm1, %v2491_v35 }
  0x89   :  { %2427 = vmatmul.msk.bf16.gmra.mxu2 %vm252_vm1, %v2523_v38  ;;  %2221 = vmatmul.msk.bf16.gmra.mxu3 %vm252_vm1, %v2509_v39 }
  0x8b   :  { %v364_v42 = vpop.f32.mrf.mxu0  ;;  %v938_v43 = vpop.f32.mrf.mxu1 }
  0x8c   :  { %v1514_v40 = vpop.f32.mrf.mxu2  ;;  %v487_v41 = vpop.f32.mrf.mxu3  ;;  %v522_v44 = vmax.f32 %v362_v36, %v364_v42  ;;  %v1096_v45 = vmax.f32 %v936_v37, %v938_v43  ;;  %v2463_v43 = vld [vmem:[%s3110_s0 + $0xe0] sm:$0xff] }
  0x93   :  { %v367_v51 = vpop.f32.mrf.mxu0  ;;  %v941_v52 = vpop.f32.mrf.mxu1 }
  0x94   :  { %v1516_v46 = vpop.f32.mrf.mxu2  ;;  %v489_v49 = vpop.f32.mrf.mxu3  ;;  %v523_v55 = vmax.f32 %v522_v44, %v367_v51  ;;  %v1097_v56 = vmax.f32 %v1096_v45, %v941_v52  ;;  %v2495_v44 = vld [vmem:[%s3110_s0 + $0x120] sm:$0xff]  ;;  %v2513_v51 = vld [vmem:[%s3110_s0 + $0x2b0] sm:$0xff] }
  0x95   :  { %v1674_v50 = vmax.f32 %v1514_v40, %v1516_v46  ;;  %v586_v26 = vmax.f32 %v489_v49, %v487_v41  ;;  %v2527_v49 = vld [vmem:[%s3110_s0 + $0x160] sm:$0xff] }
  0x96   :  { %1980 = vmatmul.msk.bf16.gmra.mxu0 %vm252_vm1, %v2460_v47  ;;  %2204 = vmatmul.msk.bf16.gmra.mxu1 %vm252_vm1, %v2492_v48 }
  0x99   :  { %2428 = vmatmul.msk.bf16.gmra.mxu2 %vm252_vm1, %v2524_v53  ;;  %2222 = vmatmul.msk.bf16.gmra.mxu3 %vm252_vm1, %v2510_v54 }
  0x9b   :  { %v369_v60 = vpop.f32.mrf.mxu0  ;;  %v943_v61 = vpop.f32.mrf.mxu1 }
  0x9c   :  { %v1519_v57 = vpop.f32.mrf.mxu2  ;;  %v492_v58 = vpop.f32.mrf.mxu3  ;;  %v524_v62 = vmax.f32 %v523_v55, %v369_v60  ;;  %v1098_v63 = vmax.f32 %v1097_v56, %v943_v61 }
  0x9d   :  { %v1675_v59 = vmax.f32 %v1674_v50, %v1519_v57  ;;  %v587_v30 = vmax.f32 %v586_v26, %v492_v58 }
  0xa3   :  { %v372_v5 = vpop.f32.mrf.mxu0  ;;  %v946_v6 = vpop.f32.mrf.mxu1 }
  0xa4   :  { %v1521_v0 = vpop.f32.mrf.mxu2  ;;  %v494_v3 = vpop.f32.mrf.mxu3  ;;  %v525_v9 = vmax.f32 %v524_v62, %v372_v5  ;;  %v1099_v10 = vmax.f32 %v1098_v63, %v946_v6  ;;  %v2464_v63 = vld [vmem:[%s3110_s0 + $0xe8] sm:$0xff] }
  0xa5   :  { %v1676_v4 = vmax.f32 %v1675_v59, %v1521_v0  ;;  %v588_v31 = vmax.f32 %v587_v30, %v494_v3  ;;  %v2496_v0 = vld [vmem:[%s3110_s0 + $0x128] sm:$0xff] }
  0xa6   :  { %1981 = vmatmul.msk.bf16.gmra.mxu0 %vm252_vm1, %v2461_v1  ;;  %2205 = vmatmul.msk.bf16.gmra.mxu1 %vm252_vm1, %v2493_v2  ;;  %v2528_v5 = vld [vmem:[%s3110_s0 + $0x168] sm:$0xff] }
  0xa9   :  { %2429 = vmatmul.msk.bf16.gmra.mxu2 %vm252_vm1, %v2525_v7  ;;  %2223 = vmatmul.msk.bf16.gmra.mxu3 %vm252_vm1, %v2511_v8  ;;  %v2514_v7 = vld [vmem:[%s3110_s0 + $0x2b8] sm:$0xff] }
  0xab   :  { %v374_v14 = vpop.f32.mrf.mxu0  ;;  %v948_v15 = vpop.f32.mrf.mxu1 }
  0xac   :  { %v1524_v11 = vpop.f32.mrf.mxu2  ;;  %v497_v12 = vpop.f32.mrf.mxu3  ;;  %v526_v16 = vmax.f32 %v525_v9, %v374_v14  ;;  %v1100_v17 = vmax.f32 %v1099_v10, %v948_v15 }
  0xad   :  { %v1677_v13 = vmax.f32 %v1676_v4, %v1524_v11  ;;  %v589_v32 = vmax.f32 %v588_v31, %v497_v12 }
  0xb3   :  { %v377_v23 = vpop.f32.mrf.mxu0  ;;  %v951_v24 = vpop.f32.mrf.mxu1 }
  0xb4   :  { %v1526_v18 = vpop.f32.mrf.mxu2  ;;  %v499_v21 = vpop.f32.mrf.mxu3  ;;  %v527_v28 = vmax.f32 %v526_v16, %v377_v23  ;;  %v1101_v29 = vmax.f32 %v1100_v17, %v951_v24 }
  0xb5   :  { %v1678_v22 = vmax.f32 %v1677_v13, %v1526_v18  ;;  %v590_v38 = vmax.f32 %v589_v32, %v499_v21 }
  0xb6   :  { %1982 = vmatmul.msk.bf16.gmra.mxu0 %vm252_vm1, %v2462_v19  ;;  %2206 = vmatmul.msk.bf16.gmra.mxu1 %vm252_vm1, %v2494_v20  ;;  %v2465_v19 = vld [vmem:[%s3110_s0 + $0xf0] sm:$0xff] }
  0xb7   :  { %v2497_v20 = vld [vmem:[%s3110_s0 + $0x130] sm:$0xff] }
  0xb9   :  { %2430 = vmatmul.msk.bf16.gmra.mxu2 %vm252_vm1, %v2526_v25  ;;  %2224 = vmatmul.msk.bf16.gmra.mxu3 %vm252_vm1, %v2512_v27  ;;  %v2529_v25 = vld [vmem:[%s3110_s0 + $0x170] sm:$0xff]  ;;  %v2540_v27 = vld [vmem:[%s3110_s0 + $0x2c8] sm:$0xff] }
  0xbb   :  { %v379_v36 = vpop.f32.mrf.mxu0  ;;  %v953_v37 = vpop.f32.mrf.mxu1 }
  0xbc   :  { %v1529_v33 = vpop.f32.mrf.mxu2  ;;  %v502_v34 = vpop.f32.mrf.mxu3  ;;  %v528_v39 = vmax.f32 %v527_v28, %v379_v36  ;;  %v1102_v40 = vmax.f32 %v1101_v29, %v953_v37 }
  0xbd   :  { %v1679_v35 = vmax.f32 %v1678_v22, %v1529_v33  ;;  %v591_v41 = vmax.f32 %v590_v38, %v502_v34 }
  0xc3   :  { %v382_v47 = vpop.f32.mrf.mxu0  ;;  %v956_v48 = vpop.f32.mrf.mxu1 }
  0xc4   :  { %v1531_v42 = vpop.f32.mrf.mxu2  ;;  %v504_v45 = vpop.f32.mrf.mxu3  ;;  %v529_v52 = vmax.f32 %v528_v39, %v382_v47  ;;  %v1103_v53 = vmax.f32 %v1102_v40, %v956_v48  ;;  %v2466_v39 = vld [vmem:[%s3110_s0 + $0xf8] sm:$0xff]  ;;  %v2541_v47 = vld [vmem:[%s3110_s0 + $0x2d0] sm:$0xff] }
  0xc5   :  { %v1680_v46 = vmax.f32 %v1679_v35, %v1531_v42  ;;  %v592_v50 = vmax.f32 %v591_v41, %v504_v45  ;;  %v2498_v40 = vld [vmem:[%s3110_s0 + $0x138] sm:$0xff] }
  0xc6   :  { %1983 = vmatmul.msk.bf16.gmra.mxu0 %vm252_vm1, %v2463_v43  ;;  %2207 = vmatmul.msk.bf16.gmra.mxu1 %vm252_vm1, %v2495_v44  ;;  %v2530_v45 = vld [vmem:[%s3110_s0 + $0x178] sm:$0xff] }
  0xc9   :  { %2431 = vmatmul.msk.bf16.gmra.mxu2 %vm252_vm1, %v2527_v49  ;;  %2225 = vmatmul.msk.bf16.gmra.mxu3 %vm252_vm1, %v2513_v51 }
  0xcb   :  { %v384_v57 = vpop.f32.mrf.mxu0  ;;  %v958_v58 = vpop.f32.mrf.mxu1 }
  0xcc   :  { %v1534_v54 = vpop.f32.mrf.mxu2  ;;  %v507_v55 = vpop.f32.mrf.mxu3  ;;  %v530_v60 = vmax.f32 %v529_v52, %v384_v57  ;;  %v1104_v61 = vmax.f32 %v1103_v53, %v958_v58 }
  0xcd   :  { %v1681_v56 = vmax.f32 %v1680_v46, %v1534_v54  ;;  %v593_v59 = vmax.f32 %v592_v50, %v507_v55 }
  0xd3   :  { %v387_v3 = vpop.f32.mrf.mxu0  ;;  %v961_v4 = vpop.f32.mrf.mxu1 }
  0xd4   :  { %v1536_v62 = vpop.f32.mrf.mxu2  ;;  %v509_v1 = vpop.f32.mrf.mxu3  ;;  %v531_v8 = vmax.f32 %v530_v60, %v387_v3  ;;  %v1105_v9 = vmax.f32 %v1104_v61, %v961_v4 }
  0xd5   :  { %v1682_v2 = vmax.f32 %v1681_v56, %v1536_v62  ;;  %v594_v6 = vmax.f32 %v593_v59, %v509_v1  ;;  %v2499_v1 = vld [vmem:[%s3110_s0 + $0x1c0] sm:$0xff] }
  0xd6   :  { %1984 = vmatmul.msk.bf16.gmra.mxu0 %vm252_vm1, %v2464_v63  ;;  %2208 = vmatmul.msk.bf16.gmra.mxu1 %vm252_vm1, %v2496_v0  ;;  %v2467_v0 = vld [vmem:[%s3110_s0 + $0x180] sm:$0xff] }
  0xd9   :  { %2432 = vmatmul.msk.bf16.gmra.mxu2 %vm252_vm1, %v2528_v5  ;;  %2226 = vmatmul.msk.bf16.gmra.mxu3 %vm252_vm1, %v2514_v7  ;;  %v2542_v7 = vld [vmem:[%s3110_s0 + $0x2d8] sm:$0xff] }
  0xdb   :  { %v389_v13 = vpop.f32.mrf.mxu0  ;;  %v963_v14 = vpop.f32.mrf.mxu1 }
  0xdc   :  { %v1539_v10 = vpop.f32.mrf.mxu2  ;;  %v512_v11 = vpop.f32.mrf.mxu3  ;;  %v532_v16 = vmax.f32 %v531_v8, %v389_v13  ;;  %v1106_v17 = vmax.f32 %v1105_v9, %v963_v14 }
  0xdd   :  { %v1683_v12 = vmax.f32 %v1682_v2, %v1539_v10  ;;  %v595_v15 = vmax.f32 %v594_v6, %v512_v11  ;;  %v2531_v6 = vld [vmem:[%s3110_s0 + $0x200] sm:$0xff] }
  0xe3   :  { %v392_v23 = vpop.f32.mrf.mxu0  ;;  %v966_v24 = vpop.f32.mrf.mxu1 }
  0xe4   :  { %v1541_v18 = vpop.f32.mrf.mxu2  ;;  %v514_v21 = vpop.f32.mrf.mxu3  ;;  %v533_v28 = vmax.f32 %v532_v16, %v392_v23  ;;  %v1107_v29 = vmax.f32 %v1106_v17, %v966_v24 }
  0xe5   :  { %v1684_v22 = vmax.f32 %v1683_v12, %v1541_v18  ;;  %v596_v26 = vmax.f32 %v595_v15, %v514_v21 }
  0xe6   :  { %1985 = vmatmul.msk.bf16.gmra.mxu0 %vm252_vm1, %v2465_v19  ;;  %2209 = vmatmul.msk.bf16.gmra.mxu1 %vm252_vm1, %v2497_v20 }
  0xe9   :  { %2433 = vmatmul.msk.bf16.gmra.mxu2 %vm252_vm1, %v2529_v25  ;;  %2444 = vmatmul.msk.bf16.vlgmr.msra.gmra.mxu3 %vm252_vm1, %v2540_v27 }
  0xeb   :  { %v394_v33 = vpop.f32.mrf.mxu0  ;;  %v968_v34 = vpop.f32.mrf.mxu1 }
  0xec   :  { %v1544_v30 = vpop.f32.mrf.mxu2  ;;  %v517_v31 = vpop.f32.mrf.mxu3  ;;  %v534_v36 = vmax.f32 %v533_v28, %v394_v33  ;;  %v1108_v37 = vmax.f32 %v1107_v29, %v968_v34  ;;  %v2468_v29 = vld [vmem:[%s3110_s0 + $0x188] sm:$0xff] }
  0xed   :  { %v1685_v32 = vmax.f32 %v1684_v22, %v1544_v30  ;;  %v2855_v35 = vmax.f32 %v596_v26, %v517_v31  ;;  %v2500_v30 = vld [vmem:[%s3110_s0 + $0x1c8] sm:$0xff] }
  0xf3   :  { %v397_v43 = vpop.f32.mrf.mxu0  ;;  %v971_v44 = vpop.f32.mrf.mxu1 }
  0xf4   :  { %v1546_v38 = vpop.f32.mrf.mxu2  ;;  %v2863_v41 = vpop.f32.mrf.mxu3  ;;  %v535_v48 = vmax.f32 %v534_v36, %v397_v43  ;;  %v1109_v49 = vmax.f32 %v1108_v37, %v971_v44  ;;  %v2532_v36 = vld [vmem:[%s3110_s0 + $0x208] sm:$0xff]  ;;  %v2543_v37 = vld [vmem:[%s3110_s0 + $0x2e0] sm:$0xff] }
  0xf5   :  { %v1686_v42 = vmax.f32 %v1685_v32, %v1546_v38  ;;  %v598_v46 = vmax.f32 %v2855_v35, %v2863_v41 }
  0xf6   :  { %1986 = vmatmul.msk.bf16.gmra.mxu0 %vm252_vm1, %v2466_v39  ;;  %2210 = vmatmul.msk.bf16.gmra.mxu1 %vm252_vm1, %v2498_v40 }
  0xf9   :  { %2434 = vmatmul.msk.bf16.gmra.mxu2 %vm252_vm1, %v2530_v45  ;;  %2445 = vmatmul.msk.bf16.gmra.mxu3 %vm252_vm1, %v2541_v47 }
  0xfb   :  { %v399_v53 = vpop.f32.mrf.mxu0  ;;  %v973_v54 = vpop.f32.mrf.mxu1 }
  0xfc   :  { %v1549_v50 = vpop.f32.mrf.mxu2  ;;  %v2877_v51 = vpop.f32.mrf.mxu3  ;;  %v536_v55 = vmax.f32 %v535_v48, %v399_v53  ;;  %v1110_v56 = vmax.f32 %v1109_v49, %v973_v54 }
  0xfd   :  { %v1687_v52 = vmax.f32 %v1686_v42, %v1549_v50  ;;  %v2469_v50 = vld [vmem:[%s3110_s0 + $0x190] sm:$0xff] }
  0xfe   :  { %v537_v57 = vrot.slane %v536_v55, 4  ;;  %v1111_v58 = vrot.slane %v1110_v56, 4 }
 0x100   :  { %v538_v59 = vmax.f32 %v536_v55, %v537_v57  ;;  %v1112_v60 = vmax.f32 %v1110_v56, %v1111_v58  ;;  %v2533_v57 = vld [vmem:[%s3110_s0 + $0x210] sm:$0xff] }
 0x102   :  { %v539_v61 = vrot.slane %v538_v59, 2  ;;  %v1113_v62 = vrot.slane %v1112_v60, 2 }
 0x103   :  { %v402_v4 = vpop.f32.mrf.mxu0  ;;  %v976_v5 = vpop.f32.mrf.mxu1 }
 0x104   :  { %v1551_v63 = vpop.f32.mrf.mxu2  ;;  %v2885_v2 = vpop.f32.mrf.mxu3  ;;  %v540_v8 = vmax.f32 %v538_v59, %v539_v61  ;;  %v1114_v9 = vmax.f32 %v1112_v60, %v1113_v62  ;;  %v2544_v59 = vld [vmem:[%s3110_s0 + $0x2e8] sm:$0xff] }
 0x105   :  { %v1688_v3 = vmax.f32 %v1687_v52, %v1551_v63  ;;  %v2501_v52 = vld [vmem:[%s3110_s0 + $0x1d0] sm:$0xff]  ;;  %v1160_v58 = vmax.f32 %v2885_v2, %v2877_v51 }
 0x106   :  { %v541_v11 = vrot.slane %v540_v8, 1  ;;  %v1115_v12 = vrot.slane %v1114_v9, 1  ;;  %1987 = vmatmul.msk.bf16.gmra.mxu0 %vm252_vm1, %v2467_v0  ;;  %2211 = vmatmul.msk.bf16.gmra.mxu1 %vm252_vm1, %v2499_v1 }
 0x107   :  { %v1689_v10 = vrot.slane %v1688_v3, 4 }
 0x108   :  { %v542_v14 = vmax.f32 %v540_v8, %v541_v11  ;;  %v1116_v15 = vmax.f32 %v1114_v9, %v1115_v12  ;;  %v2502_v11 = vld [vmem:[%s3110_s0 + $0x1d8] sm:$0xff] }
 0x109   :  { %v1690_v13 = vmax.f32 %v1688_v3, %v1689_v10  ;;  %2435 = vmatmul.msk.bf16.gmra.mxu2 %vm252_vm1, %v2531_v6  ;;  %2446 = vmatmul.msk.bf16.gmra.mxu3 %vm252_vm1, %v2542_v7  ;;  %v2470_v10 = vld [vmem:[%s3110_s0 + $0x198] sm:$0xff] }
 0x10a   :  { %v1180_v17 = vmax.f32 %v542_v14, %v1116_v15 }
 0x10b   :  { %v1691_v16 = vrot.slane %v1690_v13, 2  ;;  %v404_v21 = vpop.f32.mrf.mxu0  ;;  %v978_v22 = vpop.f32.mrf.mxu1 }
 0x10c   :  { %v1554_v18 = vpop.f32.mrf.mxu2  ;;  %v1066_v19 = vpop.f32.mrf.mxu3  ;;  %v543_v23 = vmax.f32 %v402_v4, %v404_v21  ;;  %v1117_v24 = vmax.f32 %v976_v5, %v978_v22 }
 0x10d   :  { %v1692_v20 = vmax.f32 %v1690_v13, %v1691_v16  ;;  %v1161_v62 = vmax.f32 %v1160_v58, %v1066_v19  ;;  %v2534_v16 = vld [vmem:[%s3110_s0 + $0x218] sm:$0xff] }
 0x10f   :  { %v1693_v25 = vrot.slane %v1692_v20, 1 }
 0x111   :  { %v1694_v26 = vmax.f32 %v1692_v20, %v1693_v25 }
 0x113   :  { %v2897_v27 = vmax.f32 %v1180_v17, %v1694_v26  ;;  %v407_v33 = vpop.f32.mrf.mxu0  ;;  %v981_v34 = vpop.f32.mrf.mxu1 }
 0x114   :  { %v1556_v28 = vpop.f32.mrf.mxu2  ;;  %v1068_v31 = vpop.f32.mrf.mxu3  ;;  %v544_v38 = vmax.f32 %v543_v23, %v407_v33  ;;  %v1118_v39 = vmax.f32 %v1117_v24, %v981_v34 }
 0x115   :  { %v1695_v32 = vmax.f32 %v1554_v18, %v1556_v28  ;;  %v1162_v63 = vmax.f32 %v1161_v62, %v1068_v31  ;;  %v2545_v18 = vld [vmem:[%s3110_s0 + $0x2f0] sm:$0xff]  ;;  %v2471_v31 = vld [vmem:[%s3110_s0 + $0x1a0] sm:$0xff] }
 0x116   :  { %1988 = vmatmul.msk.bf16.gmra.mxu0 %vm252_vm1, %v2468_v29  ;;  %2212 = vmatmul.msk.bf16.gmra.mxu1 %vm252_vm1, %v2500_v30 }
 0x119   :  { %2436 = vmatmul.msk.bf16.gmra.mxu2 %vm252_vm1, %v2532_v36  ;;  %2447 = vmatmul.msk.bf16.gmra.mxu3 %vm252_vm1, %v2543_v37 }
 0x11b   :  { %v409_v44 = vpop.f32.mrf.mxu0  ;;  %v983_v45 = vpop.f32.mrf.mxu1 }
 0x11c   :  { %v1559_v40 = vpop.f32.mrf.mxu2  ;;  %v1071_v42 = vpop.f32.mrf.mxu3  ;;  %v545_v47 = vmax.f32 %v544_v38, %v409_v44  ;;  %v1119_v48 = vmax.f32 %v1118_v39, %v983_v45  ;;  %v2535_v38 = vld [vmem:[%s3110_s0 + $0x220] sm:$0xff] }
 0x11d   :  { %v1696_v43 = vmax.f32 %v1695_v32, %v1559_v40  ;;  %v1163_v0 = vmax.f32 %v1162_v63, %v1071_v42  ;;  %v2503_v32 = vld [vmem:[%s3110_s0 + $0x1e0] sm:$0xff] }
 0x123   :  { %v412_v55 = vpop.f32.mrf.mxu0  ;;  %v986_v56 = vpop.f32.mrf.mxu1 }
 0x124   :  { %v1561_v49 = vpop.f32.mrf.mxu2  ;;  %v1073_v53 = vpop.f32.mrf.mxu3  ;;  %v546_v60 = vmax.f32 %v545_v47, %v412_v55  ;;  %v1120_v61 = vmax.f32 %v1119_v48, %v986_v56  ;;  %v2504_v55 = vld [vmem:[%s3110_s0 + $0x1e8] sm:$0xff] }
 0x125   :  { %v1697_v54 = vmax.f32 %v1696_v43, %v1561_v49  ;;  %v1164_v5 = vmax.f32 %v1163_v0, %v1073_v53 }
 0x126   :  { %1989 = vmatmul.msk.bf16.gmra.mxu0 %vm252_vm1, %v2469_v50  ;;  %2213 = vmatmul.msk.bf16.gmra.mxu1 %vm252_vm1, %v2501_v52 }
 0x129   :  { %2437 = vmatmul.msk.bf16.gmra.mxu2 %vm252_vm1, %v2533_v57  ;;  %2448 = vmatmul.msk.bf16.gmra.mxu3 %vm252_vm1, %v2544_v59 }
 0x12b   :  { %v414_v2 = vpop.f32.mrf.mxu0  ;;  %v988_v4 = vpop.f32.mrf.mxu1 }
 0x12c   :  { %v1564_v1 = vpop.f32.mrf.mxu2  ;;  %v1076_v3 = vpop.f32.mrf.mxu3  ;;  %v547_v6 = vmax.f32 %v546_v60, %v414_v2  ;;  %v1121_v7 = vmax.f32 %v1120_v61, %v988_v4  ;;  %v2536_v60 = vld [vmem:[%s3110_s0 + $0x228] sm:$0xff] }
 0x12d   :  { %v1698_v51 = vmax.f32 %v1697_v54, %v1564_v1  ;;  %v1165_v8 = vmax.f32 %v1164_v5, %v1076_v3  ;;  %v2472_v54 = vld [vmem:[%s3110_s0 + $0x1a8] sm:$0xff] }
 0x133   :  { %v417_v14 = vpop.f32.mrf.mxu0  ;;  %v991_v15 = vpop.f32.mrf.mxu1 }
 0x134   :  { %v1566_v9 = vpop.f32.mrf.mxu2  ;;  %v1078_v12 = vpop.f32.mrf.mxu3  ;;  %v548_v19 = vmax.f32 %v547_v6, %v417_v14  ;;  %v1122_v20 = vmax.f32 %v1121_v7, %v991_v15  ;;  %v2537_v14 = vld [vmem:[%s3110_s0 + $0x230] sm:$0xff] }
 0x135   :  { %v1699_v13 = vmax.f32 %v1698_v51, %v1566_v9  ;;  %v1166_v17 = vmax.f32 %v1165_v8, %v1078_v12  ;;  %v2473_v8 = vld [vmem:[%s3110_s0 + $0x1b0] sm:$0xff] }
 0x136   :  { %1990 = vmatmul.msk.bf16.gmra.mxu0 %vm252_vm1, %v2470_v10  ;;  %2214 = vmatmul.msk.bf16.gmra.mxu1 %vm252_vm1, %v2502_v11  ;;  %v2505_v9 = vld [vmem:[%s3110_s0 + $0x1f0] sm:$0xff] }
 0x139   :  { %2438 = vmatmul.msk.bf16.gmra.mxu2 %vm252_vm1, %v2534_v16  ;;  %2449 = vmatmul.msk.bf16.gmra.mxu3 %vm252_vm1, %v2545_v18  ;;  %v2546_v18 = vld [vmem:[%s3110_s0 + $0x2f8] sm:$0xff] }
 0x13b   :  { %v419_v24 = vpop.f32.mrf.mxu0  ;;  %v993_v25 = vpop.f32.mrf.mxu1 }
 0x13c   :  { %v1569_v21 = vpop.f32.mrf.mxu2  ;;  %v1081_v22 = vpop.f32.mrf.mxu3  ;;  %v549_v28 = vmax.f32 %v548_v19, %v419_v24  ;;  %v1123_v29 = vmax.f32 %v1122_v20, %v993_v25 }
 0x13d   :  { %v1700_v23 = vmax.f32 %v1699_v13, %v1569_v21  ;;  %v1167_v26 = vmax.f32 %v1166_v17, %v1081_v22 }
 0x143   :  { %v422_v36 = vpop.f32.mrf.mxu0  ;;  %v996_v37 = vpop.f32.mrf.mxu1 }
 0x144   :  { %v1571_v30 = vpop.f32.mrf.mxu2  ;;  %v1083_v33 = vpop.f32.mrf.mxu3  ;;  %v550_v40 = vmax.f32 %v549_v28, %v422_v36  ;;  %v1124_v42 = vmax.f32 %v1123_v29, %v996_v37  ;;  %v2506_v28 = vld [vmem:[%s3110_s0 + $0x1f8] sm:$0xff] }
 0x145   :  { %v1701_v34 = vmax.f32 %v1700_v23, %v1571_v30  ;;  %v1168_v39 = vmax.f32 %v1167_v26, %v1083_v33  ;;  %v2474_v26 = vld [vmem:[%s3110_s0 + $0x1b8] sm:$0xff] }
 0x146   :  { %1991 = vmatmul.msk.bf16.gmra.mxu0 %vm252_vm1, %v2471_v31  ;;  %2215 = vmatmul.msk.bf16.gmra.mxu1 %vm252_vm1, %v2503_v32  ;;  %v2538_v32 = vld [vmem:[%s3110_s0 + $0x238] sm:$0xff] }
 0x149   :  { %2439 = vmatmul.msk.bf16.gmra.mxu2 %vm252_vm1, %v2535_v38  ;;  %2450 = vmatmul.msk.bf16.gmra.mxu3 %vm252_vm1, %v2546_v18 }
 0x14b   :  { %v424_v47 = vpop.f32.mrf.mxu0  ;;  %v998_v48 = vpop.f32.mrf.mxu1 }
 0x14c   :  { %v1574_v43 = vpop.f32.mrf.mxu2  ;;  %v1086_v44 = vpop.f32.mrf.mxu3  ;;  %v551_v50 = vmax.f32 %v550_v40, %v424_v47  ;;  %v1125_v52 = vmax.f32 %v1124_v42, %v998_v48 }
 0x14d   :  { %v1702_v45 = vmax.f32 %v1701_v34, %v1574_v43  ;;  %v1169_v49 = vmax.f32 %v1168_v39, %v1086_v44 }
 0x153   :  { %v427_v58 = vpop.f32.mrf.mxu0  ;;  %v1001_v59 = vpop.f32.mrf.mxu1 }
 0x154   :  { %v1576_v53 = vpop.f32.mrf.mxu2  ;;  %v1088_v56 = vpop.f32.mrf.mxu3  ;;  %v552_v62 = vmax.f32 %v551_v50, %v427_v58  ;;  %v1126_v63 = vmax.f32 %v1125_v52, %v1001_v59  ;;  %v2539_v58 = vld [vmem:[%s3110_s0 + $0x2c0] sm:$0xff] }
 0x155   :  { %v1703_v57 = vmax.f32 %v1702_v45, %v1576_v53  ;;  %v1170_v61 = vmax.f32 %v1169_v49, %v1088_v56  ;;  %v2475_v53 = vld [vmem:[%s3110_s0 + $0x240] sm:$0xff] }
 0x156   :  { %1992 = vmatmul.msk.bf16.gmra.mxu0 %vm252_vm1, %v2472_v54  ;;  %2216 = vmatmul.msk.bf16.gmra.mxu1 %vm252_vm1, %v2504_v55  ;;  %v2507_v54 = vld [vmem:[%s3110_s0 + $0x280] sm:$0xff] }
 0x159   :  { %2440 = vmatmul.msk.bf16.gmra.mxu2 %vm252_vm1, %v2536_v60 }
 0x15b   :  { %v429_v51 = vpop.f32.mrf.mxu0  ;;  %v1003_v2 = vpop.f32.mrf.mxu1 }
 0x15c   :  { %v1579_v0 = vpop.f32.mrf.mxu2  ;;  %v1091_v1 = vpop.f32.mrf.mxu3  ;;  %v553_v5 = vmax.f32 %v552_v62, %v429_v51  ;;  %v1127_v6 = vmax.f32 %v1126_v63, %v1003_v2 }
 0x15d   :  { %v1704_v3 = vmax.f32 %v1703_v57, %v1579_v0  ;;  %v2973_v4 = vmax.f32 %v1170_v61, %v1091_v1 }
 0x163   :  { %v432_v12 = vpop.f32.mrf.mxu0  ;;  %v1006_v13 = vpop.f32.mrf.mxu1 }
 0x164   :  { %v1581_v7 = vpop.f32.mrf.mxu2  ;;  %v2981_v10 = vpop.f32.mrf.mxu3  ;;  %v554_v16 = vmax.f32 %v553_v5, %v432_v12  ;;  %v1128_v17 = vmax.f32 %v1127_v6, %v1006_v13 }
 0x165   :  { %v1705_v11 = vmax.f32 %v1704_v3, %v1581_v7  ;;  %v1172_v15 = vmax.f32 %v2973_v4, %v2981_v10 }
 0x166   :  { %1993 = vmatmul.msk.bf16.gmra.mxu0 %vm252_vm1, %v2473_v8  ;;  %2217 = vmatmul.msk.bf16.gmra.mxu1 %vm252_vm1, %v2505_v9 }
 0x169   :  { %2441 = vmatmul.msk.bf16.gmra.mxu2 %vm252_vm1, %v2537_v14 }
 0x16b   :  { %v434_v21 = vpop.f32.mrf.mxu0  ;;  %v1008_v22 = vpop.f32.mrf.mxu1 }
 0x16c   :  { %v1584_v19 = vpop.f32.mrf.mxu2  ;;  %v555_v23 = vmax.f32 %v554_v16, %v434_v21  ;;  %v1129_v24 = vmax.f32 %v1128_v17, %v1008_v22  ;;  %v1639_v48 = vpop.f32.mrf.mxu3 }
 0x16d   :  { %v1706_v20 = vmax.f32 %v1705_v11, %v1584_v19 }
 0x173   :  { %v437_v30 = vpop.f32.mrf.mxu0  ;;  %v1011_v31 = vpop.f32.mrf.mxu1 }
 0x174   :  { %v1586_v25 = vpop.f32.mrf.mxu2  ;;  %v556_v33 = vmax.f32 %v555_v23, %v437_v30  ;;  %v1130_v34 = vmax.f32 %v1129_v24, %v1011_v31  ;;  %v1641_v6 = vpop.f32.mrf.mxu3 }
 0x175   :  { %v1707_v29 = vmax.f32 %v1706_v20, %v1586_v25  ;;  %v1738_v22 = vmax.f32 %v1641_v6, %v1639_v48 }
 0x176   :  { %1994 = vmatmul.msk.bf16.gmra.mxu0 %vm252_vm1, %v2474_v26  ;;  %2218 = vmatmul.msk.bf16.gmra.mxu1 %vm252_vm1, %v2506_v28 }
 0x179   :  { %2442 = vmatmul.msk.bf16.gmra.mxu2 %vm252_vm1, %v2538_v32 }
 0x17b   :  { %v439_v38 = vpop.f32.mrf.mxu0  ;;  %v1013_v39 = vpop.f32.mrf.mxu1 }
 0x17c   :  { %v1589_v36 = vpop.f32.mrf.mxu2  ;;  %v557_v40 = vmax.f32 %v556_v33, %v439_v38  ;;  %v1131_v42 = vmax.f32 %v1130_v34, %v1013_v39  ;;  %v1644_v25 = vpop.f32.mrf.mxu3 }
 0x17d   :  { %v1708_v37 = vmax.f32 %v1707_v29, %v1589_v36  ;;  %v3022_v26 = vmax.f32 %v1738_v22, %v1644_v25  ;;  %v1797_v22 = vld [vmem:[%s3113_s3 + $0x58] sm:$0xff] }
 0x17e   :  { %v558_v43 = vrot.slane %v557_v40, 4  ;;  %v1132_v44 = vrot.slane %v1131_v42, 4 }
 0x180   :  { %v559_v45 = vmax.f32 %v557_v40, %v558_v43  ;;  %v1133_v47 = vmax.f32 %v1131_v42, %v1132_v44 }
 0x182   :  { %v560_v49 = vrot.slane %v559_v45, 2  ;;  %v1134_v50 = vrot.slane %v1133_v47, 2 }
 0x183   :  { %v442_v56 = vpop.f32.mrf.mxu0  ;;  %v1016_v57 = vpop.f32.mrf.mxu1 }
 0x184   :  { %v1591_v52 = vpop.f32.mrf.mxu2  ;;  %v561_v59 = vmax.f32 %v559_v45, %v560_v49  ;;  %v1135_v60 = vmax.f32 %v1133_v47, %v1134_v50 }
 0x185   :  { %v1709_v55 = vmax.f32 %v1708_v37, %v1591_v52 }
 0x186   :  { %v562_v62 = vrot.slane %v561_v59, 1  ;;  %v1136_v63 = vrot.slane %v1135_v60, 1  ;;  %1995 = vmatmul.msk.bf16.gmra.mxu0 %vm252_vm1, %v2475_v53  ;;  %2219 = vmatmul.msk.bf16.gmra.mxu1 %vm252_vm1, %v2507_v54 }
 0x187   :  { %v1710_v61 = vrot.slane %v1709_v55, 4 }
 0x188   :  { %v563_v1 = vmax.f32 %v561_v59, %v562_v62  ;;  %v1137_v3 = vmax.f32 %v1135_v60, %v1136_v63  ;;  %v1801_v62 = vld [vmem:[%s3113_s3 + $0x78] sm:$0xff] }
 0x189   :  { %v1711_v0 = vmax.f32 %v1709_v55, %v1710_v61  ;;  %2443 = vmatmul.msk.bf16.gmra.mxu2 %vm252_vm1, %v2539_v58  ;;  %v3024_v55 = vpop.f32.mrf.mxu3  ;;  %1806 = vmatpush.msrb.mxu3 %v1801_v62 }
 0x18a   :  { %v1181_v2 = vmax.f32 %v563_v1, %v1137_v3 }
 0x18b   :  { %v1712_v51 = vrot.slane %v1711_v0, 2  ;;  %v444_v8 = vpop.f32.mrf.mxu0  ;;  %v1018_v9 = vpop.f32.mrf.mxu1 }
 0x18c   :  { %v1594_v5 = vpop.f32.mrf.mxu2  ;;  %v564_v11 = vmax.f32 %v442_v56, %v444_v8  ;;  %v1138_v12 = vmax.f32 %v1016_v57, %v1018_v9 }
 0x18d   :  { %v1713_v7 = vmax.f32 %v1711_v0, %v1712_v51 }
 0x18f   :  { %v1714_v13 = vrot.slane %v1713_v7, 1 }
 0x191   :  { %v1715_v14 = vmax.f32 %v1713_v7, %v1714_v13  ;;  %v3029_v0 = vpop.f32.mrf.mxu3 }
 0x193   :  { %v1759_v16 = vmax.f32 %v1181_v2, %v1715_v14  ;;  %v447_v20 = vpop.f32.mrf.mxu0  ;;  %v1021_v21 = vpop.f32.mrf.mxu1  ;;  %v1800_v2 = vld [vmem:[%s3113_s3 + $0x70] sm:$0xff] }
 0x194   :  { %v1596_v17 = vpop.f32.mrf.mxu2  ;;  %v565_v23 = vmax.f32 %v564_v11, %v447_v20  ;;  %v1139_v24 = vmax.f32 %v1138_v12, %v1021_v21  ;;  %1807 = vmatpush.msrb.mxu3 %v1800_v2  ;;  %v1799_v11 = vld [vmem:[%s3113_s3 + $0x68] sm:$0xff] }
 0x195   :  { %v3020_v18 = vsel %vm1767_vm2, %v1759_v16, %v2897_v27  ;;  %v1716_v19 = vmax.f32 %v1594_v5, %v1596_v17  ;;  %v1798_v16 = vld [vmem:[%s3113_s3 + $0x60] sm:$0xff] }
 0x196   :  { %1808 = vmatpush.msrb.mxu3 %v1799_v11 }
 0x198   :  { %1809 = vmatpush.msrb.mxu3 %v1798_v16 }
 0x199   :  { %v3034_v9 = vpop.f32.mrf.mxu3 }
 0x19a   :  { %1810 = vmatpush.msrb.mxu3 %v1797_v22 }
 0x19b   :  { %v449_v30 = vpop.f32.mrf.mxu0  ;;  %v1023_v31 = vpop.f32.mrf.mxu1 }
 0x19c   :  { %v1599_v28 = vpop.f32.mrf.mxu2  ;;  %v566_v32 = vmax.f32 %v565_v23, %v449_v30  ;;  %v1140_v33 = vmax.f32 %v1139_v24, %v1023_v31  ;;  %v1796_v31 = vld [vmem:[%s3113_s3 + $0x50] sm:$0xff] }
 0x19d   :  { %v1717_v29 = vmax.f32 %v1716_v19, %v1599_v28  ;;  %1811 = vmatpush.msrb.mxu3 %v1796_v31 }
 0x1a1   :  { %v3042_v17 = vpop.f32.mrf.mxu3 }
 0x1a3   :  { %v452_v37 = vpop.f32.mrf.mxu0  ;;  %v1026_v27 = vpop.f32.mrf.mxu1 }
 0x1a4   :  { %v1601_v34 = vpop.f32.mrf.mxu2  ;;  %v567_v38 = vmax.f32 %v566_v32, %v452_v37  ;;  %v1141_v39 = vmax.f32 %v1140_v33, %v1026_v27 }
 0x1a5   :  { %v1718_v36 = vmax.f32 %v1717_v29, %v1601_v34 }
 0x1a9   :  { %v3047_v23 = vpop.f32.mrf.mxu3 }
 0x1ab   :  { %v454_v43 = vpop.f32.mrf.mxu0  ;;  %v1028_v44 = vpop.f32.mrf.mxu1 }
 0x1ac   :  { %v1604_v40 = vpop.f32.mrf.mxu2  ;;  %v568_v45 = vmax.f32 %v567_v38, %v454_v43  ;;  %v1142_v47 = vmax.f32 %v1141_v39, %v1028_v44  ;;  %v1795_v44 = vld [vmem:[%s3113_s3 + $0x48] sm:$0xff] }
 0x1ad   :  { %v1719_v42 = vmax.f32 %v1718_v36, %v1604_v40  ;;  %1812 = vmatpush.msrb.mxu3 %v1795_v44 }
 0x1b1   :  { %v3049_v30 = vpop.f32.mrf.mxu3 }
 0x1b3   :  { %v457_v50 = vpop.f32.mrf.mxu0  ;;  %v1031_v52 = vpop.f32.mrf.mxu1 }
 0x1b4   :  { %v1606_v48 = vpop.f32.mrf.mxu2  ;;  %v569_v53 = vmax.f32 %v568_v45, %v457_v50  ;;  %v1143_v54 = vmax.f32 %v1142_v47, %v1031_v52  ;;  %v1794_v45 = vld [vmem:[%s3113_s3 + $0x40] sm:$0xff] }
 0x1b5   :  { %v1720_v49 = vmax.f32 %v1719_v42, %v1606_v48  ;;  %1813 = vmatpush.msrb.mxu3 %v1794_v45 }
 0x1bb   :  { %v459_v58 = vpop.f32.mrf.mxu0  ;;  %v1033_v59 = vpop.f32.mrf.mxu1 }
 0x1bc   :  { %v1609_v56 = vpop.f32.mrf.mxu2  ;;  %v570_v60 = vmax.f32 %v569_v53, %v459_v58  ;;  %v1144_v61 = vmax.f32 %v1143_v54, %v1033_v59  ;;  %v1740_v54 = vmax.f32 %v3022_v26, %v3024_v55  ;;  %v2580_v26 = vmov -inf  }
 0x1bd   :  { %v1721_v57 = vmax.f32 %v1720_v49, %v1609_v56  ;;  %v3060_v49 = vpop.f32.mrf.mxu3  ;;  %v1793_v56 = vld [vmem:[%s3113_s3 + $0x38] sm:$0xff]  ;;  %26 = vst [vmem:[#allocation2] sm:$0xf] %v2580_v26  ;;  %v1786_v26 = vld [vmem:[%s3113_s3] sm:$0xff] }
 0x1be   :  { %1814 = vmatpush.msrb.mxu3 %v1793_v56  ;;  %v1741_v55 = vmax.f32 %v1740_v54, %v3029_v0  ;;  %v1790_v54 = vld [vmem:[%s3113_s3 + $0x20] sm:$0xff] }
 0x1c3   :  { %v462_v3 = vpop.f32.mrf.mxu0  ;;  %v1036_v51 = vpop.f32.mrf.mxu1 }
 0x1c4   :  { %v1611_v63 = vpop.f32.mrf.mxu2  ;;  %v571_v34 = vmax.f32 %v570_v60, %v462_v3  ;;  %v1145_v36 = vmax.f32 %v1144_v61, %v1036_v51  ;;  %v1791_v61 = vld [vmem:[%s3113_s3 + $0x28] sm:$0xff] }
 0x1c5   :  { %v1722_v1 = vmax.f32 %v1721_v57, %v1611_v63  ;;  %v1792_v57 = vld [vmem:[%s3113_s3 + $0x30] sm:$0xff] }
 0x1c6   :  { %1815 = vmatpush.msrb.mxu3 %v1792_v57 }
 0x1c8   :  { %1816 = vmatpush.msrb.mxu3 %v1791_v61 }
 0x1ca   :  { %1817 = vmatpush.msrb.mxu3 %v1790_v54 }
 0x1cb   :  { %v464_v7 = vpop.f32.mrf.mxu0  ;;  %v1038_v8 = vpop.f32.mrf.mxu1 }
 0x1cc   :  { %v1614_v5 = vpop.f32.mrf.mxu2  ;;  %v572_v37 = vmax.f32 %v571_v34, %v464_v7  ;;  %v1146_v27 = vmax.f32 %v1145_v36, %v1038_v8 }
 0x1cd   :  { %v1723_v6 = vmax.f32 %v1722_v1, %v1614_v5 }
 0x1d3   :  { %v467_v13 = vpop.f32.mrf.mxu0  ;;  %v1041_v14 = vpop.f32.mrf.mxu1 }
 0x1d4   :  { %v1616_v12 = vpop.f32.mrf.mxu2  ;;  %v573_v38 = vmax.f32 %v572_v37, %v467_v13  ;;  %v1147_v39 = vmax.f32 %v1146_v27, %v1041_v14  ;;  %v1742_v13 = vmax.f32 %v1741_v55, %v3034_v9 }
 0x1d5   :  { %v1724_v53 = vmax.f32 %v1723_v6, %v1616_v12  ;;  %v1664_v12 = vpop.f32.mrf.mxu3 }
 0x1d6   :  { %v1743_v0 = vmax.f32 %v1742_v13, %v3042_v17 }
 0x1d8   :  { %v1744_v9 = vmax.f32 %v1743_v0, %v3047_v23  ;;  %v1762_v0 = vld [vmem:[#allocation2] sm:$0xf] }
 0x1da   :  { %v1745_v44 = vmax.f32 %v1744_v9, %v3049_v30  ;;  %v1789_v30 = vld [vmem:[%s3113_s3 + $0x18] sm:$0xff] }
 0x1db   :  { %v469_v20 = vpop.f32.mrf.mxu0  ;;  %v1043_v21 = vpop.f32.mrf.mxu1  ;;  %1818 = vmatpush.msrb.mxu3 %v1789_v30 }
 0x1dc   :  { %v1619_v19 = vpop.f32.mrf.mxu2  ;;  %v574_v47 = vmax.f32 %v573_v38, %v469_v20  ;;  %v1148_v48 = vmax.f32 %v1147_v39, %v1043_v21  ;;  %v1746_v57 = vmax.f32 %v1745_v44, %v3060_v49 }
 0x1dd   :  { %v1725_v60 = vmax.f32 %v1724_v53, %v1619_v19  ;;  %v1666_v37 = vpop.f32.mrf.mxu3 }
 0x1de   :  { %v1747_v61 = vmax.f32 %v1746_v57, %v1664_v12 }
 0x1e3   :  { %v472_v25 = vpop.f32.mrf.mxu0  ;;  %v1046_v28 = vpop.f32.mrf.mxu1 }
 0x1e4   :  { %v1621_v24 = vpop.f32.mrf.mxu2  ;;  %v575_v50 = vmax.f32 %v574_v47, %v472_v25  ;;  %v1149_v52 = vmax.f32 %v1148_v48, %v1046_v28 }
 0x1e5   :  { %v1726_v3 = vmax.f32 %v1725_v60, %v1621_v24  ;;  %v1787_v60 = vld [vmem:[%s3113_s3 + $0x8] sm:$0xff] }
 0x1eb   :  { %v474_v32 = vpop.f32.mrf.mxu0  ;;  %v1048_v33 = vpop.f32.mrf.mxu1 }
 0x1ec   :  { %v1624_v29 = vpop.f32.mrf.mxu2  ;;  %v576_v58 = vmax.f32 %v575_v50, %v474_v32  ;;  %v1150_v59 = vmax.f32 %v1149_v52, %v1048_v33 }
 0x1ed   :  { %v1727_v7 = vmax.f32 %v1726_v3, %v1624_v29 }
 0x1f3   :  { %v477_v42 = vpop.f32.mrf.mxu0  ;;  %v1051_v43 = vpop.f32.mrf.mxu1 }
 0x1f4   :  { %v1626_v40 = vpop.f32.mrf.mxu2  ;;  %v577_v62 = vmax.f32 %v576_v58, %v477_v42  ;;  %v1151_v63 = vmax.f32 %v1150_v59, %v1051_v43  ;;  %v1669_v58 = vpop.f32.mrf.mxu3 }
 0x1f5   :  { %v1728_v14 = vmax.f32 %v1727_v7, %v1626_v40 }
 0x1fb   :  { %v479_v51 = vpop.f32.mrf.mxu0  ;;  %v1053_v2 = vpop.f32.mrf.mxu1 }
 0x1fc   :  { %v1629_v1 = vpop.f32.mrf.mxu2  ;;  %v578_v5 = vmax.f32 %v577_v62, %v479_v51  ;;  %v1152_v6 = vmax.f32 %v1151_v63, %v1053_v2 }
 0x1fd   :  { %v1729_v20 = vmax.f32 %v1728_v14, %v1629_v1 }
 0x1fe   :  { %v579_v8 = vrot.slane %v578_v5, 4  ;;  %v1153_v11 = vrot.slane %v1152_v6, 4 }
 0x200   :  { %v580_v16 = vmax.f32 %v578_v5, %v579_v8  ;;  %v1154_v19 = vmax.f32 %v1152_v6, %v1153_v11  ;;  %v1671_v11 = vpop.f32.mrf.mxu3 }
 0x202   :  { %v581_v21 = vrot.slane %v580_v16, 2  ;;  %v1155_v22 = vrot.slane %v1154_v19, 2 }
 0x203   :  { %v482_v28 = vpop.f32.mrf.mxu0  ;;  %v1056_v31 = vpop.f32.mrf.mxu1 }
 0x204   :  { %v1631_v25 = vpop.f32.mrf.mxu2  ;;  %v582_v32 = vmax.f32 %v580_v16, %v581_v21  ;;  %v1156_v33 = vmax.f32 %v1154_v19, %v1155_v22 }
 0x205   :  { %v1730_v24 = vmax.f32 %v1729_v20, %v1631_v25 }
 0x206   :  { %v583_v34 = vrot.slane %v582_v32, 1  ;;  %v1157_v36 = vrot.slane %v1156_v33, 1 }
 0x207   :  { %v1731_v29 = vrot.slane %v1730_v24, 4 }
 0x208   :  { %v584_v38 = vmax.f32 %v582_v32, %v583_v34  ;;  %v1158_v39 = vmax.f32 %v1156_v33, %v1157_v36  ;;  %v2553_v34 = vld [vmem:[%s3114_s4] ss:$0 sm:$0xff] }
 0x209   :  { %v1732_v27 = vmax.f32 %v1730_v24, %v1731_v29 }
 0x20a   :  { %v1182_v42 = vmax.f32 %v584_v38, %v1158_v39 }
 0x20b   :  { %v1733_v40 = vrot.slane %v1732_v27, 2  ;;  %v484_v45 = vpop.f32.mrf.mxu0  ;;  %v1058_v47 = vpop.f32.mrf.mxu1 }
 0x20c   :  { %v1634_v43 = vpop.f32.mrf.mxu2  ;;  %v585_v48 = vmax.f32 %v482_v28, %v484_v45  ;;  %v1159_v50 = vmax.f32 %v1056_v31, %v1058_v47  ;;  %v2552_v31 = vld [vmem:[%s3112_s2] ss:$0 sm:$0xff] }
 0x20d   :  { %v1734_v17 = vmax.f32 %v1732_v27, %v1733_v40 }
 0x20e   :  { %v599_v53 = vmax.f32 %v598_v46, %v585_v48  ;;  %v1173_v23 = vmax.f32 %v1172_v15, %v1159_v50  ;;  %v1788_v46 = vld [vmem:[%s3113_s3 + $0x10] sm:$0xff] }
 0x20f   :  { %v1735_v52 = vrot.slane %v1734_v17, 1  ;;  %1819 = vmatpush.msrb.mxu3 %v1788_v46 }
 0x210   :  { %v600_v35 = vrot.slane %v599_v53, 4  ;;  %v1174_v41 = vrot.slane %v1173_v23, 4 }
 0x211   :  { %v1736_v56 = vmax.f32 %v1734_v17, %v1735_v52  ;;  %1820 = vmatpush.msrb.mxu3 %v1787_v60 }
 0x212   :  { %v601_v15 = vmax.f32 %v599_v53, %v600_v35  ;;  %v1175_v59 = vmax.f32 %v1173_v23, %v1174_v41 }
 0x213   :  { %v1760_v4 = vmax.f32 %v1182_v42, %v1736_v56  ;;  %1821 = vmatpush.msrb.mxu3 %v1786_v26 }
 0x214   :  { %v1636_v10 = vpop.f32.mrf.mxu2  ;;  %v602_v63 = vrot.slane %v601_v15, 2  ;;  %v1176_v1 = vrot.slane %v1175_v59, 2 }
 0x215   :  { %v1770_v49 = vsel %vm1769_vm3, %v1760_v4, %v3020_v18  ;;  %v1737_v62 = vmax.f32 %v1634_v43, %v1636_v10 }
 0x216   :  { %v603_v3 = vmax.f32 %v601_v15, %v602_v63  ;;  %v1177_v51 = vmax.f32 %v1175_v59, %v1176_v1 }
 0x217   :  { %v1748_v55 = vmax.f32 %v1747_v61, %v1737_v62 }
 0x218   :  { %v604_v5 = vrot.slane %v603_v3, 1  ;;  %v1178_v6 = vrot.slane %v1177_v51, 1 }
 0x219   :  { %v1749_v2 = vmax.f32 %v1748_v55, %v1666_v37 }
 0x21a   :  { %v605_v8 = vmax.f32 %v603_v3, %v604_v5  ;;  %v1179_v18 = vmax.f32 %v1177_v51, %v1178_v6 }
 0x21b   :  { %v1750_v7 = vmax.f32 %v1749_v2, %v1669_v58 }
 0x21c   :  { %v1183_v13 = vmax.f32 %v605_v8, %v1179_v18 }
 0x21d   :  { %v1751_v12 = vmax.f32 %v1750_v7, %v1671_v11 }
 0x21f   :  { %v1752_v14 = vrot.slane %v1751_v12, 4 }
 0x221   :  { %v1753_v16 = vmax.f32 %v1751_v12, %v1752_v14 }
 0x223   :  { %v1754_v19 = vrot.slane %v1753_v16, 2 }
 0x225   :  { %v1755_v20 = vmax.f32 %v1753_v16, %v1754_v19 }
 0x227   :  { %v1756_v21 = vrot.slane %v1755_v20, 1 }
 0x229   :  { %v1757_v22 = vmax.f32 %v1755_v20, %v1756_v21 }
 0x22b   :  { %v1761_v25 = vmax.f32 %v1183_v13, %v1757_v22 }
 0x22d   :  { %v1772_v24 = vsel %vm1771_vm4, %v1761_v25, %v1770_v49 }
 0x22e   :  { %v1774_v28 = vmax.f32 %v1762_v0, %v1772_v24 }
 0x230   :  { %1775 = vst [vmem:[#allocation2] sm:$0xf] %v1774_v28 }
 0x237   :  { %v1779_v32 = vld [vmem:[#allocation2] sm:$0xf] }
 0x238   :  { %v1784_v33 = vadd.f32 %v2552_v31, %v1779_v32 }
 0x23a   :  { %v1785_v29 = vmax.f32 %v1784_v33, 0.0 }
 0x23c   :  { %1822 = vmatmul.f32.vlgmr.msrb.gmra.mxu3 %v1785_v29 }
 0x2bf   :  { %v1823_v36 = vpop.f32.mrf.mxu3 }
 0x2c0   :  { %v1824_v37 = vadd.f32 %v2553_v34, %v1823_v36 }
 0x2c2   :  { %1826 = vst [vmem:[#allocation3] sm:$0xf] %v1824_v37 }
 0x2c3   :  { %1837 = dma.vmem_to_hbm [thread:$0]  %s1833_s12, 64, %s1835_s15, [#allocation4]  }
 0x2c4   :  { %2578 = dma.done.wait [#allocation4], 64  }
 0x2c5   :  { %2579 = vsyncadd [#allocation4], 4294967232 }
 0x2c6   :  { %1842 = vsyncpa [#allocation4], 1 }

</bundles_post_ra>
